<compile_context>
chip_gen: v7x
topology: tpu7x:2x2x1
jax: 0.10.0
libtpu: 0.0.40
codegen_flags: <defaults>
</compile_context>

<pallas_src>
from functools import lru_cache

import numpy as np
import jax
import jax.numpy as jnp
from jax.experimental import pallas as pl
from jax.experimental.pallas import tpu as pltpu


# ----------------------------- parameter setup ------------------------------

def _make_window(win_len, win_type):
    if win_type is None or win_type == "None":
        return np.ones(win_len, dtype=np.float64)
    # scipy.signal.get_window('hamming', n, fftbins=True)  (periodic hamming)
    k = np.arange(win_len)
    return 0.54 - 0.46 * np.cos(2.0 * np.pi * k / win_len)


def init_kernels(win_len, fft_len, win_type="hamming", invers=False):
    window = _make_window(win_len, win_type)
    N = fft_len
    fourier_basis = np.fft.rfft(np.eye(N))[:win_len]            # (win_len, N//2+1)
    real_kernel = np.real(fourier_basis)
    imag_kernel = np.imag(fourier_basis)
    kernel = np.concatenate([real_kernel, imag_kernel], 1).T    # (N+2, win_len)
    if invers:
        kernel = np.linalg.pinv(kernel).T                       # (N+2, win_len)
    kernel = kernel * window
    return kernel.astype(np.float32), window.astype(np.float32)


# ------------------------------- Pallas kernels -------------------------------

@lru_cache(maxsize=None)
def _build_runner(win_len, win_inc, fft_len, win_type, B, T):
    C = fft_len + 2
    K = win_len
    s = win_inc
    L = (T - 1) * s + K              # conv_transpose1d output length
    crop = K - s                     # outputs[..., K-s : -(K-s)]
    Lc = L - 2 * crop
    assert Lc > 0, "sequence too short for the requested crop"

    # Host-side normalization constant (depends only on window, T, s, K).
    window = _make_window(win_len, win_type).astype(np.float64)
    wsq = window ** 2
    coff = np.zeros(L, np.float64)
    for t in range(T):
        coff[t * s:t * s + K] += wsq
    norm_np = (1.0 / (coff + 1e-8)).astype(np.float32)[crop:L - crop]  # (Lc,)

    if K % s == 0:
        # ----------------------- fast, vectorized path -----------------------
        r = K // s                   # number of overlapping frames per sample
        Tc = T - r + 1               # cropped output rows (of width s)
        T_pad = ((T + 7) // 8) * 8   # sublane-aligned frame count

        # Batch tile: fill the MXU M-dim, but keep the x block modest (VMEM).
        Bt = min(B, max(1, -(-256 // T_pad)))
        Bt = max(1, min(Bt, max(1, (4 << 20) // (T_pad * C * 4))))
        B_pad = -(-B // Bt) * Bt

        norm2d = jnp.asarray(norm_np.reshape(Tc, s))             # (Tc, s)

        def kernel(x_ref, w_ref, n_ref, o_ref):
            # x_ref: (Bt, T_pad, C), w_ref: (C, K), n_ref: (Tc, s),
            # o_ref: (Bt, Tc, s)
            x = x_ref[...].reshape(Bt * T_pad, C)
            frames = jnp.dot(x, w_ref[...],
                             preferred_element_type=jnp.float32)  # (Bt*T_pad, K)
            frames = frames.reshape(Bt, T_pad, K)
            # Vectorized overlap-add: every cropped row gets all r chunks.
            acc = frames[:, r - 1:r - 1 + Tc, 0:s]
            for j in range(1, r):
                acc = acc + frames[:, r - 1 - j:r - 1 - j + Tc, j * s:(j + 1) * s]
            o_ref[...] = acc * n_ref[...]

        call = pl.pallas_call(
            kernel,
            out_shape=jax.ShapeDtypeStruct((B_pad, Tc, s), jnp.float32),
            grid=(B_pad // Bt,),
            in_specs=[
                pl.BlockSpec((Bt, T_pad, C), lambda i: (i, 0, 0)),
                pl.BlockSpec((C, K), lambda i: (0, 0)),
                pl.BlockSpec((Tc, s), lambda i: (0, 0)),
            ],
            out_specs=pl.BlockSpec((Bt, Tc, s), lambda i: (i, 0, 0)),
            compiler_params=pltpu.CompilerParams(
                dimension_semantics=("parallel",)),
        )

        def run(inputs_bct, weight):
            x = jnp.transpose(inputs_bct, (0, 2, 1)).astype(jnp.float32)  # (B,T,C)
            x = jnp.pad(x, ((0, B_pad - B), (0, T_pad - T), (0, 0)))
            out = call(x, weight.astype(jnp.float32), norm2d)             # (B_pad,Tc,s)
            return out[:B].reshape(B, 1, Lc)

        return jax.jit(run)

    # -------------------- fallback path (K % s != 0) --------------------
    # TODO(synk): the vectorized OLA assumes win_len % win_inc == 0; this path
    # keeps the per-frame overlap-add loop (still with host-side normalization).
    norm1d = jnp.asarray(norm_np.reshape(1, Lc))

    def kernel_slow(x_ref, w_ref, n_ref, o_ref, acc_ref):
        # x_ref: (T, C), w_ref: (C, K), n_ref: (1, Lc), o_ref: (1, Lc)
        frames = jnp.dot(x_ref[...], w_ref[...],
                         preferred_element_type=jnp.float32)     # (T, K)
        acc_ref[...] = jnp.zeros_like(acc_ref)
        for t in range(T):
            acc_ref[:, pl.ds(t * s, K)] += frames[t:t + 1, :]
        o_ref[...] = acc_ref[:, crop:L - crop] * n_ref[...]

    call_slow = pl.pallas_call(
        kernel_slow,
        out_shape=jax.ShapeDtypeStruct((B, 1, Lc), jnp.float32),
        grid=(B,),
        in_specs=[
            pl.BlockSpec((None, T, C), lambda b: (b, 0, 0)),
            pl.BlockSpec((C, K), lambda b: (0, 0)),
            pl.BlockSpec((1, Lc), lambda b: (0, 0)),
        ],
        out_specs=pl.BlockSpec((None, 1, Lc), lambda b: (b, 0, 0)),
        scratch_shapes=[pltpu.VMEM((1, L), jnp.float32)],
        compiler_params=pltpu.CompilerParams(
            dimension_semantics=("parallel",)),
    )

    def run_slow(inputs_bct, weight):
        x = jnp.transpose(inputs_bct, (0, 2, 1)).astype(jnp.float32)
        return call_slow(x, weight.astype(jnp.float32), norm1d)

    return jax.jit(run_slow)


# ------------------------------ module wrapper -------------------------------

class ConviSTFT:
    def __init__(self, win_len, win_inc, fft_len=None, win_type="hamming",
                 feature_type="real"):
        if fft_len is None:
            fft_len = int(2 ** np.ceil(np.log2(win_len)))
        self.fft_len = fft_len
        self.win_len = win_len
        self.stride = win_inc
        self.win_type = win_type
        self.feature_type = feature_type
        self.dim = fft_len
        kernel, window = init_kernels(win_len, fft_len, win_type, invers=True)
        self.weight = jnp.asarray(kernel)            # (fft_len+2, win_len)
        self.window = jnp.asarray(window)            # (win_len,)

    def __call__(self, inputs, phase=None):
        # inputs: [B, fft_len+2, T] (complex spec) or, with phase, [B, fft//2+1, T]
        if phase is not None:
            real = inputs * jnp.cos(phase)
            imag = inputs * jnp.sin(phase)
            inputs = jnp.concatenate([real, imag], axis=1)
        B, C, T = inputs.shape
        if C != self.fft_len + 2:
            raise ValueError(
                f"expected {self.fft_len + 2} channels (real/imag stacked), got {C}")
        run = _build_runner(self.win_len, self.stride, self.fft_len,
                            self.win_type, B, T)
        return run(inputs, self.weight)


# --------------------------------- reference ---------------------------------

def reference(inputs, weight, window, stride, win_len):
    B, C, T = inputs.shape
    K = win_len
    L = (T - 1) * stride + K
    frames = jnp.einsum("bct,ck->btk", inputs, weight)
    out = jnp.zeros((B, L), jnp.float32)
    coff = jnp.zeros((L,), jnp.float32)
    for t in range(T):
        out = out.at[:, t * stride:t * stride + K].add(frames[:, t])
        coff = coff.at[t * stride:t * stride + K].add(window ** 2)
    out = out / (coff[None, :] + 1e-8)
    crop = K - stride
    return out[:, None, crop:L - crop]


if __name__ == "__main__":
    key = jax.random.PRNGKey(0)
    k1, k2, k3, k4, k5 = jax.random.split(key, 5)

    # --- test 1: fast path (r=2), complex-spec input -------------------------
    B, win_len, win_inc, fft_len, T = 2, 16, 8, 16, 8
    C = fft_len + 2
    spec = jax.random.normal(k1, (B, C, T), dtype=jnp.float32)
    istft = ConviSTFT(win_len, win_inc, fft_len, win_type="hamming")
    out = jax.block_until_ready(istft(spec))
    ref = reference(spec, istft.weight, istft.window, win_inc, win_len)
    assert out.shape == ref.shape, (out.shape, ref.shape)
    assert jnp.allclose(out, ref, rtol=2e-2, atol=2e-2), \
        float(jnp.max(jnp.abs(out - ref)))

    # --- test 1b: magnitude + phase path --------------------------------------
    mags = jnp.abs(jax.random.normal(k2, (B, fft_len // 2 + 1, T), jnp.float32))
    phase = jax.random.normal(k3, (B, fft_len // 2 + 1, T), jnp.float32)
    out_p = jax.block_until_ready(istft(mags, phase))
    spec_p = jnp.concatenate([mags * jnp.cos(phase), mags * jnp.sin(phase)], axis=1)
    ref_p = reference(spec_p, istft.weight, istft.window, win_inc, win_len)
    assert jnp.allclose(out_p, ref_p, rtol=2e-2, atol=2e-2), \
        float(jnp.max(jnp.abs(out_p - ref_p)))

    # --- test 2: fast path (r=4), T not a multiple of 8 -----------------------
    B2, win_inc2, T2 = 3, 4, 10
    spec2 = jax.random.normal(k4, (B2, C, T2), dtype=jnp.float32)
    istft2 = ConviSTFT(win_len, win_inc2, fft_len, win_type="hamming")
    out2 = jax.block_until_ready(istft2(spec2))
    ref2 = reference(spec2, istft2.weight, istft2.window, win_inc2, win_len)
    assert out2.shape == ref2.shape, (out2.shape, ref2.shape)
    assert jnp.allclose(out2, ref2, rtol=2e-2, atol=2e-2), \
        float(jnp.max(jnp.abs(out2 - ref2)))

    # --- test 3: fallback path (win_len % win_inc != 0) ------------------------
    B3, win_inc3, T3 = 2, 6, 9
    spec3 = jax.random.normal(k5, (B3, C, T3), dtype=jnp.float32)
    istft3 = ConviSTFT(win_len, win_inc3, fft_len, win_type="hamming")
    out3 = jax.block_until_ready(istft3(spec3))
    ref3 = reference(spec3, istft3.weight, istft3.window, win_inc3, win_len)
    assert out3.shape == ref3.shape, (out3.shape, ref3.shape)
    assert jnp.allclose(out3, ref3, rtol=2e-2, atol=2e-2), \
        float(jnp.max(jnp.abs(out3 - ref3)))

    print("KERNEL_OK")
</pallas_src>

<mosaic_0001>
module attributes {stable_mosaic.version = 11 : i64} {
  func.func @kernel(%arg0: i32, %arg1: memref<2x8x18xf32, #tpu.memory_space<vmem>>, %arg2: memref<18x16xf32, #tpu.memory_space<vmem>>, %arg3: memref<7x8xf32, #tpu.memory_space<vmem>>, %arg4: memref<2x7x8xf32, #tpu.memory_space<vmem>>) attributes {dimension_semantics = [#tpu.dimension_semantics<parallel>], iteration_bounds = array<i64: 1>, scalar_prefetch = 0 : i64, scratch_operands = 0 : i64, tpu.core_type = #tpu.core_type<tc>, window_params = [{transform_indices = @transform_0, window_bounds = array<i64: 2, 8, 18>}, {pipeline_mode = #tpu.pipeline_mode<synchronous>, transform_indices = @transform_1, window_bounds = array<i64: 18, 16>}, {pipeline_mode = #tpu.pipeline_mode<synchronous>, transform_indices = @transform_2, window_bounds = array<i64: 7, 8>}, {transform_indices = @transform_3, window_bounds = array<i64: 2, 7, 8>}]} {
    %c0 = arith.constant 0 : index
    %c0_0 = arith.constant 0 : index
    %c0_1 = arith.constant 0 : index
    %0 = vector.load %arg1[%c0, %c0_0, %c0_1] : memref<2x8x18xf32, #tpu.memory_space<vmem>>, vector<2x8x18xf32>
    %1 = vector.shape_cast %0 : vector<2x8x18xf32> to vector<16x18xf32>
    %c0_2 = arith.constant 0 : index
    %c0_3 = arith.constant 0 : index
    %2 = vector.load %arg2[%c0_2, %c0_3] : memref<18x16xf32, #tpu.memory_space<vmem>>, vector<18x16xf32>
    %cst = arith.constant dense<0.000000e+00> : vector<16x16xf32>
    %3 = tpu.matmul %1, %2, %cst {dimension_numbers = #tpu.dot_dimension_numbers<[1], [0], [0], [1], [0, 0, 1, 1], [], []>} : vector<16x18xf32>, vector<18x16xf32>, vector<16x16xf32> -> vector<16x16xf32>
    %4 = vector.shape_cast %3 : vector<16x16xf32> to vector<2x8x16xf32>
    %5 = vector.extract_strided_slice %4 {offsets = [0, 1, 0], sizes = [2, 7, 8], strides = [1, 1, 1]} : vector<2x8x16xf32> to vector<2x7x8xf32>
    %6 = vector.extract_strided_slice %4 {offsets = [0, 0, 8], sizes = [2, 7, 8], strides = [1, 1, 1]} : vector<2x8x16xf32> to vector<2x7x8xf32>
    %7 = arith.addf %5, %6 : vector<2x7x8xf32>
    %c0_4 = arith.constant 0 : index
    %c0_5 = arith.constant 0 : index
    %8 = vector.load %arg3[%c0_4, %c0_5] : memref<7x8xf32, #tpu.memory_space<vmem>>, vector<7x8xf32>
    %9 = vector.shape_cast %8 : vector<7x8xf32> to vector<1x7x8xf32>
    %10 = vector.broadcast %9 : vector<1x7x8xf32> to vector<2x7x8xf32>
    %11 = arith.mulf %7, %10 : vector<2x7x8xf32>
    %c0_6 = arith.constant 0 : index
    %c0_7 = arith.constant 0 : index
    %c0_8 = arith.constant 0 : index
    %12 = vector.load %arg4[%c0_6, %c0_7, %c0_8] : memref<2x7x8xf32, #tpu.memory_space<vmem>>, vector<2x7x8xf32>
    tpu.vector_store %arg4[%c0_6, %c0_7, %c0_8], %11 {strides = array<i32>} : memref<2x7x8xf32, #tpu.memory_space<vmem>>, vector<2x7x8xf32>,
    return
  }
  func.func @transform_0(%arg0: i32) -> (i32, i32, i32) {
    %c0_i32 = arith.constant 0 : i32
    %c0_i32_0 = arith.constant 0 : i32
    %c0_i32_1 = arith.constant 0 : i32
    return %arg0, %c0_i32, %c0_i32_0 : i32, i32, i32
  }
  func.func @transform_1(%arg0: i32) -> (i32, i32) {
    %c0_i32 = arith.constant 0 : i32
    %c0_i32_0 = arith.constant 0 : i32
    %c0_i32_1 = arith.constant 0 : i32
    return %c0_i32, %c0_i32_0 : i32, i32
  }
  func.func @transform_2(%arg0: i32) -> (i32, i32) {
    %c0_i32 = arith.constant 0 : i32
    %c0_i32_0 = arith.constant 0 : i32
    %c0_i32_1 = arith.constant 0 : i32
    return %c0_i32, %c0_i32_0 : i32, i32
  }
  func.func @transform_3(%arg0: i32) -> (i32, i32, i32) {
    %c0_i32 = arith.constant 0 : i32
    %c0_i32_0 = arith.constant 0 : i32
    %c0_i32_1 = arith.constant 0 : i32
    return %arg0, %c0_i32, %c0_i32_0 : i32, i32, i32
  }
}

</mosaic_0001>

<bundles_post_ra>
// kernel: run.1
= control target key start
LH: loop header
LB: loop body
LE: loop exit
PB: predicated region body
PF: predicated region fallthrough
CT: control target
= control target key end

     0   :  { %vm19_vm0 = vcmask 146432   ;;  %vm26_vm1 = vcmask 1041408   ;;  %s152_s22 = smov 120   ;;  %vm123_vm2 = vcmask 64513   ;;  %s197_s1 = inlined_call_operand.vmem [shape: f32[18,16], index: 1, kind: input, shape index: {}]   ;;  %s198_s0 = inlined_call_operand.vmem [shape: f32[2,8,18], index: 0, kind: input, shape index: {}]   ;;  %s199_s2 = inlined_call_operand.vmem [shape: f32[7,8], index: 2, kind: input, shape index: {}]   ;;  %s200_s3 = inlined_call_operand.vmem [shape: f32[2,7,8], index: 3, kind: output, shape index: {}]  }
   0x1   :  { %v16_v0 = vld [vmem:[%s197_s1] sm:$0xff]  ;;  %v17_v1 = vld [vmem:[%s197_s1 + $0x8] sm:$0xff]  ;;  %v18_v4 = vld [vmem:[%s197_s1 + $0x10] sm:$0x3] }
   0x2   :  { %v147_v2 = vpack.c.bf16 %v17_v1, %v16_v0  ;;  %v14_v3 = vld [vmem:[%s198_s0] sm:$0xff]  ;;  %v15_v5 = vld [vmem:[%s198_s0 + $0x8] sm:$0xff] }
   0x3   :  { %144 = vmatprep.mubr.msk.f32.mxu0 %vm19_vm0, %v14_v3  ;;  %v117_v10 = vld [vmem:[%s199_s2] sm:$0x7f] }
   0x4   :  { %148 = vmatprep.subr.bf16.mxu0 %v147_v2  ;;  %v119_v11 = vrot.slane %v117_v10, 7 }
   0x5   :  { %150 = vmatpush3.bf16.msra.mxu0 %v147_v2 }
   0x6   :  { %142 = vmatprep.subr.msk.mxu0 %vm26_vm1, %v18_v4 }
   0x9   :  { %143 = vmatpush3.msk.msra.mxu0 %vm26_vm1, %v18_v4 }
   0xa   :  { %145 = vmatmul.mubr.msk.f32.vlgmr.msra.gmra.mrb[0].mxu0 %vm19_vm0, %v15_v5 }
  0xdd   :  { %v146_v6 = vpop.f32.mrb[0].mxu0 }
  0xde   :  { %v96_v7 = vpop.f32.mrb[1].mxu0  ;;  %v108_v9 = vrot.slane %v146_v6, 7 }
  0xdf   :  { %v107_v8 = vrot.slane %v96_v7, 7 }
  0xe1   :  { %109 = vrot.lane.b32.xlu0 %v107_v8, %s152_s22 }
  0xe5   :  { %111 = vrot.lane.b32.xlu0 %v108_v9, %s152_s22 }
 0x153   :  { %v110_v12 = vpop.permute.xlu0 %109 }
 0x154   :  { %v115_v13 = vadd.f32 %v110_v12, %v96_v7 }
 0x156   :  { %v121_v14 = vmul.f32 %v119_v11, %v115_v13 }
 0x157   :  { %v112_v15 = vpop.permute.xlu0 %111 }
 0x158   :  { %124 = vst.msk [vmem:[%s200_s3 - $0x1] sm:$0xfe] %vm123_vm2, %v121_v14  ;;  %v116_v16 = vadd.f32 %v146_v6, %v112_v15 }
 0x15a   :  { %v122_v17 = vmul.f32 %v119_v11, %v116_v16 }
 0x15c   :  { %125 = vst.msk [vmem:[%s200_s3 + $0x7] sm:$0xfe] %vm123_vm2, %v122_v17 }

</bundles_post_ra>
